<compile_context>
chip_gen: v6e
topology: v6e:2x2x1
jax: 0.10.0
libtpu: 0.0.40
codegen_flags: <defaults>
</compile_context>

<pallas_src>
import functools
from types import SimpleNamespace

import numpy as np
import jax
import jax.numpy as jnp
from jax import lax
from jax.experimental import pallas as pl
from jax.experimental.pallas import tpu as pltpu


_PAD_SENTINEL = 1.0e6    # pad rows sit this far away -> their RBF entries underflow to 0.0


def _vmem_limit_bytes():
    """~half of physical VMEM, capped at 48 MiB (v5e/v6e -> 48 MiB, v7x (64 MiB/TC) -> 32 MiB)."""
    cap = 128 * 1024 * 1024
    try:
        cap = int(getattr(pltpu.get_tpu_info(), "vmem_capacity_bytes", cap))
    except Exception:
        pass
    return min(48 * 1024 * 1024, cap // 2)


def _pick_tile(n_pad):
    """Largest tile in {512, 256, 128} dividing n_pad, preferring >=4 (else >=2) tiles so the
    parallel grid axis can feed both v7x TensorCores and the DMA pipeline has depth."""
    for min_nt in (4, 2, 1):
        for t in (512, 256, 128):
            if n_pad % t == 0 and n_pad // t >= min_nt:
                return t
    return n_pad


# ---------------------------------------------------------------------------
# Pallas kernels
# ---------------------------------------------------------------------------
def _rbf_degree_kernel(x_r_ref, x_c_ref, sq_r_ref, sq_c_ref, d_ref, k_ref, *,
                       inv_two_sigma_sq):
    """Pass A: one RBF tile (cached to HBM as bf16) + degree accumulation d_j = sum_i K_ij.

    grid = (col tile jt [parallel], row tile it [reduction]); the d block is resident
    across the it axis and initialised with pl.when.
    """
    it = pl.program_id(1)

    @pl.when(it == 0)
    def _():
        d_ref[...] = jnp.zeros_like(d_ref)

    # MXU Gram tile: bf16 operands (pre-cast in the wrapper), f32 accumulation.
    g = lax.dot_general(x_r_ref[...], x_c_ref[...], (((1,), (1,)), ((), ())),
                        preferred_element_type=jnp.float32)            # (tm, tn) f32
    # Squared distances from the precomputed row/col norms; clamp cancellation noise.
    d2 = jnp.maximum(sq_r_ref[...] + sq_c_ref[...] - 2.0 * g, 0.0)     # (tm, tn) f32
    k = jnp.exp(-d2 * inv_two_sigma_sq)                                 # f32 (EUP)
    d_ref[...] += jnp.sum(k, axis=0, keepdims=True)                     # (1, tn) lane-dense
    k_ref[...] = k.astype(jnp.bfloat16)                                 # cache for pass B


def _trace_kernel(k_ref, a_i_ref, a_j_ref, loss_ref):
    """Pass B: per-(row tile, col tile) contribution to term1 = -0.5 * tr(A K A^T),
    with A = h_class * r precomputed (bf16) in the wrapper.

        m    = A_J @ K_IJ^T        (p, tm)   MXU, tile-deep contraction
        part = sum(A_I * m)                  (p, tm) elementwise + reduce (tiny)
    """
    jt = pl.program_id(1)

    @pl.when(jt == 0)
    def _():
        loss_ref[...] = jnp.zeros_like(loss_ref)

    m = lax.dot_general(a_j_ref[...], k_ref[...], (((1,), (1,)), ((), ())),
                        preferred_element_type=jnp.float32)             # (p, tm) f32
    part = jnp.sum(a_i_ref[...].astype(jnp.float32) * m)
    # NOTE: loss_ref is a lane-dense (1, 8, 128) block holding the SAME scalar in every
    # element (uniform broadcast accumulate); the host reads element [it, 0, 0].
    loss_ref[...] += -0.5 * part


# ---------------------------------------------------------------------------
# Module
# ---------------------------------------------------------------------------
class SemiSupRkmLayer:
    def __init__(self, cfg, x, l, c, layerwisein=False, key=None):
        self.eta = float(cfg.eta)
        self.lam1 = float(cfg.lam1)
        self.lam2 = float(cfg.lam2)
        self.gamma = float(cfg.gamma)
        self.sigma = float(cfg.kernel1.param)               # kernel1 = RBF(sigma)

        if cfg.kernel2.type in ('zero', 'no', 'none', None):
            self.multiview = False
        else:
            # TODO(synk): 'wwl' second kernel (graph kernel on an external dataset) has no
            # clean in-script Pallas equivalent; only the single-view path is implemented.
            raise AssertionError

        self.p = int(c.shape[1])
        self.n = int(x.shape[0])
        self.l = jnp.asarray(l, jnp.float32).reshape(1, self.n)   # (1, n) lane-dense row
        self.c = jnp.asarray(c, jnp.float32)                      # (n, p)

        if key is None:
            key = jax.random.PRNGKey(0)
        k1, k2, k3 = jax.random.split(key, 3)
        # deterministic stand-ins for torch.randn parameters
        self.h_class = jax.random.normal(k1, (self.p, self.n), jnp.float32)
        self.r = jax.random.normal(k2, (self.n,), jnp.float32)
        self.bias = jax.random.normal(k3, (self.p,), jnp.float32)

        if layerwisein:
            # TODO(synk): solve_and_update() needs a dense LU solve (torch.linalg.solve) and
            # np.isclose-based zeroing — no clean Pallas equivalent; not implemented.
            pass

    # ------------------------------------------------------------------ forward
    def forward(self, x=None):
        # Plain transpose: a Pallas kernel here would emit lane-sparse (p=8) masked stores
        # plus launch/per-step overhead for a tiny copy XLA handles for free.
        return self.h_class.T

    # ------------------------------------------------------------------ loss
    def loss(self, x):
        x = jnp.asarray(x, jnp.float32)
        n, dfeat = x.shape
        assert n == self.n, "loss(x) expects the training set used at construction"
        p = self.p

        # Pad the sample axis up to a multiple of 128 with far-away sentinel rows so the
        # (8,128)-aligned tiled path works for any n (pad K entries underflow to 0).
        n_pad = ((n + 127) // 128) * 128
        if n_pad != n:
            x_pad = jnp.concatenate(
                [x, jnp.full((n_pad - n, dfeat), _PAD_SENTINEL, jnp.float32)], axis=0)
        else:
            x_pad = x
        tile = _pick_tile(n_pad)
        nt = n_pad // tile
        vmem_limit = _vmem_limit_bytes()

        inv_two_sigma_sq = 1.0 / (2.0 * self.sigma * self.sigma)
        sq = jnp.sum(x_pad * x_pad, axis=1)                  # (n_pad,) f32, computed once
        sq_col = sq.reshape(n_pad, 1)                        # row-tile norms  -> (tile, 1)
        sq_row = sq.reshape(1, n_pad)                        # col-tile norms  -> (1, tile)
        x_bf = x_pad.astype(jnp.bfloat16)                    # halves streamed DMA bytes

        # ---- pass A: RBF tiles (cached to HBM, bf16) + degree row, tiled & accumulated ----
        deg_kernel = functools.partial(_rbf_degree_kernel,
                                       inv_two_sigma_sq=inv_two_sigma_sq)
        d_row, k_mat = pl.pallas_call(
            deg_kernel,
            out_shape=(jax.ShapeDtypeStruct((1, n_pad), jnp.float32),
                       jax.ShapeDtypeStruct((n_pad, n_pad), jnp.bfloat16)),
            grid=(nt, nt),                                   # (col tile jt, row tile it)
            in_specs=[pl.BlockSpec((tile, dfeat), lambda jt, it: (it, 0)),   # x rows of K
                      pl.BlockSpec((tile, dfeat), lambda jt, it: (jt, 0)),   # x cols of K
                      pl.BlockSpec((tile, 1), lambda jt, it: (it, 0)),       # sq rows
                      pl.BlockSpec((1, tile), lambda jt, it: (0, jt))],      # sq cols
            out_specs=(pl.BlockSpec((1, tile), lambda jt, it: (0, jt)),      # d (accum)
                       pl.BlockSpec((tile, tile), lambda jt, it: (it, jt))), # K cache
            compiler_params=pltpu.CompilerParams(
                dimension_semantics=("parallel", "arbitrary"),
                vmem_limit_bytes=vmem_limit),
            cost_estimate=pl.CostEstimate(
                flops=int(2 * n_pad * n_pad * dfeat + 5 * n_pad * n_pad),
                transcendentals=int(n_pad * n_pad),
                bytes_accessed=int(2 * 2 * nt * n_pad * dfeat + 8 * n_pad
                                   + 2 * n_pad * n_pad)),
        )(x_bf, x_bf, sq_col, sq_row)

        # ---- hoisted, reduction-invariant plain-JAX pieces (O(n) / O(n*p)) ----
        d = d_row[:, :n]                                     # drop pad columns
        r = (1.0 / d) / self.lam1 - self.l / self.lam2       # exact reciprocal, (1, n)
        a = self.h_class * r                                 # (p, n) = H R
        if n_pad != n:
            a_full = jnp.pad(a, ((0, 0), (0, n_pad - n)))    # zero A on pad columns
        else:
            a_full = a
        a_bf = a_full.astype(jnp.bfloat16)                   # cast once, not per tile

        term2 = 0.5 * jnp.sum(self.h_class * self.h_class * r)      # 0.5 * tr(H R H^T)
        term3 = jnp.sum(self.h_class * self.c.T) / self.lam2        # tr(H C) / lam2
        s = jnp.sum(a)                                               # zerosum(r @ H^T)
        zs = (s * s) / n

        # ---- pass B: term1 = -0.5 * tr(A K A^T), streaming the cached K tiles ----
        loss_parts = pl.pallas_call(
            _trace_kernel,
            out_shape=jax.ShapeDtypeStruct((nt, 8, 128), jnp.float32),
            grid=(nt, nt),                                   # (row tile it, col tile jt)
            in_specs=[pl.BlockSpec((tile, tile), lambda it, jt: (it, jt)),   # K tile
                      pl.BlockSpec((p, tile), lambda it, jt: (0, it)),       # A_I
                      pl.BlockSpec((p, tile), lambda it, jt: (0, jt))],      # A_J
            out_specs=pl.BlockSpec((1, 8, 128), lambda it, jt: (it, 0, 0)),
            compiler_params=pltpu.CompilerParams(
                dimension_semantics=("parallel", "arbitrary"),
                vmem_limit_bytes=vmem_limit),
            cost_estimate=pl.CostEstimate(
                flops=int(2 * n_pad * n_pad * p + 2 * nt * n_pad * p),
                transcendentals=0,
                bytes_accessed=int(2 * n_pad * n_pad + 2 * 2 * nt * n_pad * p
                                   + 4 * nt * 8 * 128)),
        )(k_mat, a_bf, a_bf)

        term1 = jnp.sum(loss_parts[:, 0, 0])
        loss = self.gamma * (term1 + term2 - term3) / n
        return loss, zs


# ---------------------------------------------------------------------------
# Pure-JAX reference (mirrors the PyTorch code) for correctness checking
# ---------------------------------------------------------------------------
def _loss_reference(x, h, c, l_row, sigma, lam1, lam2, gamma):
    n = x.shape[0]
    g = x @ x.T
    sq = jnp.sum(x * x, axis=1, keepdims=True)
    k = jnp.exp(-(sq + sq.T - 2.0 * g) / (2.0 * sigma * sigma))
    d = jnp.sum(k, axis=1)
    r = (1.0 / d) / lam1 - l_row.reshape(-1) / lam2
    rmat = jnp.diag(r)
    loss = (-0.5 * jnp.trace(h @ rmat @ k @ rmat @ h.T)
            + 0.5 * jnp.trace(h @ rmat @ h.T)
            - jnp.trace(h @ c) / lam2)
    s = jnp.sum(r @ h.T)                 # zerosum(r @ h.T)[0]
    zs = (s * s) / n
    return gamma * loss / n, zs


# ---------------------------------------------------------------------------
if __name__ == "__main__":
    # Small shapes implied by the module: n samples, d features, p classes.
    # n = 256 -> tile = 128, grid = (2, 2): exercises tiling, accumulation and pl.when init.
    n, dfeat, p = 256, 32, 8

    key = jax.random.PRNGKey(0)
    kx, kc, kl, kmod = jax.random.split(key, 4)
    x = jax.random.normal(kx, (n, dfeat), jnp.float32)
    c = jax.random.normal(kc, (n, p), jnp.float32)          # label-coding matrix (n, p)
    l = jax.random.normal(kl, (n,), jnp.float32)            # per-sample label weights

    cfg = SimpleNamespace(
        eta=1.0, lam1=1.0, lam2=1.0, gamma=1.0,
        kernel1=SimpleNamespace(type='rbf', param=4.0, param2=None),
        kernel2=SimpleNamespace(type='none'),
    )

    layer = SemiSupRkmLayer(cfg, x, l, c, layerwisein=False, key=kmod)

    # forward pass (plain transpose per perf review — no Pallas launch for a tiny copy)
    out = jax.block_until_ready(layer.forward())
    np.testing.assert_allclose(np.asarray(out), np.asarray(layer.h_class.T),
                               rtol=0, atol=0)

    # tiled Pallas loss (RBF+degree pass, hoisted JAX terms, cached-K trace pass)
    loss_v, zs_v = layer.loss(x)
    loss_v = jax.block_until_ready(loss_v)
    zs_v = jax.block_until_ready(zs_v)

    loss_r, zs_r = _loss_reference(x, layer.h_class, layer.c, layer.l,
                                   layer.sigma, layer.lam1, layer.lam2, layer.gamma)
    np.testing.assert_allclose(np.asarray(loss_v), np.asarray(loss_r),
                               rtol=2e-2, atol=2e-2)
    np.testing.assert_allclose(np.asarray(zs_v), np.asarray(zs_r),
                               rtol=2e-2, atol=2e-2)

    # exercise the padding path (n not a multiple of 128 -> padded to 256, tile 128)
    n2 = 200
    kx2, kc2, kl2, kmod2 = jax.random.split(jax.random.PRNGKey(1), 4)
    x2 = jax.random.normal(kx2, (n2, dfeat), jnp.float32)
    c2 = jax.random.normal(kc2, (n2, p), jnp.float32)
    l2 = jax.random.normal(kl2, (n2,), jnp.float32)
    layer2 = SemiSupRkmLayer(cfg, x2, l2, c2, layerwisein=False, key=kmod2)
    loss2_v, zs2_v = layer2.loss(x2)
    loss2_v = jax.block_until_ready(loss2_v)
    zs2_v = jax.block_until_ready(zs2_v)
    loss2_r, zs2_r = _loss_reference(x2, layer2.h_class, layer2.c, layer2.l,
                                     layer2.sigma, layer2.lam1, layer2.lam2, layer2.gamma)
    np.testing.assert_allclose(np.asarray(loss2_v), np.asarray(loss2_r),
                               rtol=2e-2, atol=2e-2)
    np.testing.assert_allclose(np.asarray(zs2_v), np.asarray(zs2_r),
                               rtol=2e-2, atol=2e-2)

    print("KERNEL_OK")
</pallas_src>

<mosaic_0001>
module attributes {stable_mosaic.version = 11 : i64} {
  func.func @_rbf_degree_kernel(%arg0: i32, %arg1: i32, %arg2: memref<128x32xbf16, #tpu.memory_space<vmem>>, %arg3: memref<128x32xbf16, #tpu.memory_space<vmem>>, %arg4: memref<128x1xf32, #tpu.memory_space<vmem>>, %arg5: memref<1x128xf32, #tpu.memory_space<vmem>>, %arg6: memref<1x128xf32, #tpu.memory_space<vmem>>, %arg7: memref<128x128xbf16, #tpu.memory_space<vmem>>) attributes {dimension_semantics = [#tpu.dimension_semantics<parallel>, #tpu.dimension_semantics<arbitrary>], iteration_bounds = array<i64: 2, 2>, scalar_prefetch = 0 : i64, scratch_operands = 0 : i64, tpu.core_type = #tpu.core_type<tc>, window_params = [{transform_indices = @transform_0, window_bounds = array<i64: 128, 32>}, {transform_indices = @transform_1, window_bounds = array<i64: 128, 32>}, {transform_indices = @transform_2, window_bounds = array<i64: 128, 1>}, {transform_indices = @transform_3, window_bounds = array<i64: 1, 128>}, {transform_indices = @transform_4, window_bounds = array<i64: 1, 128>}, {transform_indices = @transform_5, window_bounds = array<i64: 128, 128>}]} {
    %c0_i32 = arith.constant 0 : i32
    %0 = arith.cmpi eq, %arg1, %c0_i32 : i32
    %1 = arith.extui %0 : i1 to i32
    %c0_i32_0 = arith.constant 0 : i32
    %2 = arith.cmpi ne, %1, %c0_i32_0 : i32
    scf.if %2 {
      %cst_19 = arith.constant 0.000000e+00 : f32
      %28 = vector.broadcast %cst_19 : f32 to vector<1x128xf32>
      %c0_20 = arith.constant 0 : index
      %c0_21 = arith.constant 0 : index
      %29 = vector.load %arg6[%c0_20, %c0_21] : memref<1x128xf32, #tpu.memory_space<vmem>>, vector<1x128xf32>
      tpu.vector_store %arg6[%c0_20, %c0_21], %28 {strides = array<i32>} : memref<1x128xf32, #tpu.memory_space<vmem>>, vector<1x128xf32>,
    } else {
    }
    %c0 = arith.constant 0 : index
    %c0_1 = arith.constant 0 : index
    %3 = vector.load %arg2[%c0, %c0_1] : memref<128x32xbf16, #tpu.memory_space<vmem>>, vector<128x32xbf16>
    %c0_2 = arith.constant 0 : index
    %c0_3 = arith.constant 0 : index
    %4 = vector.load %arg3[%c0_2, %c0_3] : memref<128x32xbf16, #tpu.memory_space<vmem>>, vector<128x32xbf16>
    %cst = arith.constant dense<0.000000e+00> : vector<128x128xf32>
    %5 = tpu.matmul %3, %4, %cst {dimension_numbers = #tpu.dot_dimension_numbers<[1], [1], [0], [0], [0, 0, 1, 0], [], []>} : vector<128x32xbf16>, vector<128x32xbf16>, vector<128x128xf32> -> vector<128x128xf32>
    %c0_4 = arith.constant 0 : index
    %c0_5 = arith.constant 0 : index
    %6 = vector.load %arg4[%c0_4, %c0_5] : memref<128x1xf32, #tpu.memory_space<vmem>>, vector<128x1xf32>
    %c0_6 = arith.constant 0 : index
    %c0_7 = arith.constant 0 : index
    %7 = vector.load %arg5[%c0_6, %c0_7] : memref<1x128xf32, #tpu.memory_space<vmem>>, vector<1x128xf32>
    %8 = vector.broadcast %6 : vector<128x1xf32> to vector<128x128xf32>
    %9 = vector.broadcast %7 : vector<1x128xf32> to vector<128x128xf32>
    %10 = arith.addf %8, %9 : vector<128x128xf32>
    %cst_8 = arith.constant 2.000000e+00 : f32
    %11 = vector.broadcast %cst_8 : f32 to vector<128x128xf32>
    %12 = arith.mulf %11, %5 : vector<128x128xf32>
    %13 = arith.subf %10, %12 : vector<128x128xf32>
    %cst_9 = arith.constant 0.000000e+00 : f32
    %14 = vector.broadcast %cst_9 : f32 to vector<128x128xf32>
    %15 = arith.maximumf %13, %14 : vector<128x128xf32>
    %cst_10 = arith.constant 0.000000e+00 : f32
    %16 = vector.broadcast %cst_10 : f32 to vector<128x128xf32>
    %17 = arith.subf %16, %15 : vector<128x128xf32>
    %cst_11 = arith.constant 3.125000e-02 : f32
    %18 = vector.broadcast %cst_11 : f32 to vector<128x128xf32>
    %19 = arith.mulf %17, %18 : vector<128x128xf32>
    %20 = math.exp %19 : vector<128x128xf32>
    %c0_12 = arith.constant 0 : index
    %c0_13 = arith.constant 0 : index
    %21 = vector.load %arg6[%c0_12, %c0_13] : memref<1x128xf32, #tpu.memory_space<vmem>>, vector<1x128xf32>
    %cst_14 = arith.constant dense<0.000000e+00> : vector<128xf32>
    %22 = vector.multi_reduction <add>, %20, %cst_14 [0] : vector<128x128xf32> to vector<128xf32>
    %23 = vector.shape_cast %22 : vector<128xf32> to vector<1x128xf32>
    %24 = arith.addf %21, %23 : vector<1x128xf32>
    %c0_15 = arith.constant 0 : index
    %c0_16 = arith.constant 0 : index
    %25 = vector.load %arg6[%c0_15, %c0_16] : memref<1x128xf32, #tpu.memory_space<vmem>>, vector<1x128xf32>
    tpu.vector_store %arg6[%c0_15, %c0_16], %24 {strides = array<i32>} : memref<1x128xf32, #tpu.memory_space<vmem>>, vector<1x128xf32>,
    %26 = arith.truncf %20 : vector<128x128xf32> to vector<128x128xbf16>
    %c0_17 = arith.constant 0 : index
    %c0_18 = arith.constant 0 : index
    %27 = vector.load %arg7[%c0_17, %c0_18] : memref<128x128xbf16, #tpu.memory_space<vmem>>, vector<128x128xbf16>
    tpu.vector_store %arg7[%c0_17, %c0_18], %26 {strides = array<i32>} : memref<128x128xbf16, #tpu.memory_space<vmem>>, vector<128x128xbf16>,
    return
  }
  func.func @transform_0(%arg0: i32, %arg1: i32) -> (i32, i32) {
    %c0_i32 = arith.constant 0 : i32
    %c0_i32_0 = arith.constant 0 : i32
    return %arg1, %c0_i32 : i32, i32
  }
  func.func @transform_1(%arg0: i32, %arg1: i32) -> (i32, i32) {
    %c0_i32 = arith.constant 0 : i32
    %c0_i32_0 = arith.constant 0 : i32
    return %arg0, %c0_i32 : i32, i32
  }
  func.func @transform_2(%arg0: i32, %arg1: i32) -> (i32, i32) {
    %c0_i32 = arith.constant 0 : i32
    %c0_i32_0 = arith.constant 0 : i32
    return %arg1, %c0_i32 : i32, i32
  }
  func.func @transform_3(%arg0: i32, %arg1: i32) -> (i32, i32) {
    %c0_i32 = arith.constant 0 : i32
    %c0_i32_0 = arith.constant 0 : i32
    return %c0_i32, %arg0 : i32, i32
  }
  func.func @transform_4(%arg0: i32, %arg1: i32) -> (i32, i32) {
    %c0_i32 = arith.constant 0 : i32
    %c0_i32_0 = arith.constant 0 : i32
    return %c0_i32, %arg0 : i32, i32
  }
  func.func @transform_5(%arg0: i32, %arg1: i32) -> (i32, i32) {
    %c0_i32 = arith.constant 0 : i32
    return %arg1, %arg0 : i32, i32
  }
}

</mosaic_0001>

<bundles_post_ra>
// kernel: tpu_custom_call.1
= control target key start
LH: loop header
LB: loop body
LE: loop exit
PB: predicated region body
PF: predicated region fallthrough
CT: control target
= control target key end

     0   :  { %11 = vsyncpa [#allocation3], 0  ;;  %s2011_s0 = inlined_call_operand.vmem [shape: bf16[256,32], index: 0, kind: input, shape index: {}]   ;;  %s2012_s1 = inlined_call_operand.vmem [shape: bf16[256,32], index: 1, kind: input, shape index: {}]   ;;  %s2013_s2 = inlined_call_operand.vmem [shape: f32[256,1], index: 2, kind: input, shape index: {}]   ;;  %s2014_s3 = inlined_call_operand.vmem [shape: f32[1,256], index: 3, kind: input, shape index: {}]   ;;  %s2015_s4 = inlined_call_operand.hbm [shape: f32[1,256], index: 4, kind: output, shape index: {0}]   ;;  %s2016_s5 = inlined_call_operand.hbm [shape: bf16[256,256], index: 5, kind: output, shape index: {1}]  }
   0x1   :  { %13 = vsyncpa [#allocation3 + $0x1], 0 }
   0x2   :  { %14 = vsyncpa [#allocation5], 0 }
   0x3   :  { %16 = vsyncpa [#allocation5 + $0x1], 0  ;;  %s1621_s18 = smov 0   ;;  %s1623_s19 = smov 0  }
   0x4   :  { %s1625_s20 = smov 0   ;;  %s1627_s21 = smov 0  }
   0x5   :  { %s1629_s22 = smov 0   ;;  %s1631_s23 = smov 0  }
   0x6   :  { %s1633_s24 = smov 0   ;;  %s1635_s25 = smov 0  }
   0x7   :  { %s1637_s26 = smov 0   ;;  %s1639_s27 = smov 0  }
   0x8   :  { %s1641_s28 = smov 0  }
   0x9 LB: > { %2028 = sst [smem:[#allocation8_spill]] %s1542_s18  ;;  %s1076_s29 = sadd.s32 4294967295, %s1582_s28   ;;  %s1582_s28 = sphi %s1641_s28, %s22_s28   ;;  %s1578_s27 = sphi %s1639_s27, %s2061_s27   ;;  %s1574_s26 = sphi %s1637_s26, %s2060_s26   ;;  %s1570_s25 = sphi %s1635_s25, %s2066_s25   ;;  %s1566_s24 = sphi %s1633_s24, %s2058_s24   ;;  %s1562_s23 = sphi %s1631_s23, %s2057_s23   ;;  %s1558_s22 = sphi %s1629_s22, %s2065_s22   ;;  %s1554_s21 = sphi %s1627_s21, %s2064_s21   ;;  %s1550_s20 = sphi %s1625_s20, %s2055_s20   ;;  %s1546_s19 = sphi %s1623_s19, %s2063_s19   ;;  %s1542_s18 = sphi %s1621_s18, %s2062_s18  }
   0xa   : > { %2029 = sst [smem:[#allocation9_spill]] %s1550_s20  ;;  %s1077_s30 = sadd.s32 4294967294, %s1582_s28  }
   0xb   : > { %2030 = sst [smem:[#allocation10_spill]] %s1554_s21  ;;  %s31_s6 = sadd.s32 1, %s1574_s26 }
   0xc   : > { %2031 = sst [smem:[#allocation11_spill]] %s1562_s23  ;;  %s34_s7 = sadd.s32 1, %s1578_s27 }
   0xd   : > { %2032 = sst [smem:[#allocation12_spill]] %s1574_s26  ;;  %p32_p0 = scmp.ge.s32.totalorder %s31_s6, 2 }
   0xe   : > { %2033 = sst [smem:[#allocation13_spill]] %s1578_s27  ;;  %s145_s8 = sadd.s32 1, %s1562_s23 }
   0xf   : > { %p155_p1 = scmp.ne.s32.totalorder %s1562_s23, %s1558_s22  ;;  %p1683_p2 = scmp.eq.s32.totalorder %s1076_s29, 3 }
  0x10   : > { %s2068_s6 = smov (%p32_p0, %s31_s6), 0  ;;  %s2070_s7 = smov (!%p32_p0, %s34_s7), %s1578_s27 }
  0x11   : > { %2035 = sst [smem:[#allocation14_spill]] %s2068_s6  ;;  %p1692_p3 = por %p1683_p2, %p155_p1 }
  0x12   : > { %p161_p4 = scmp.ne.s32.totalorder %s1558_s22, %s1554_s21  ;;  %p36_p5 = scmp.ge.s32.totalorder %s2070_s7, 2 }
  0x13   : > { %p1698_p6 = scmp.eq.s32.totalorder %s1077_s30, 3  ;;  %s168_s12 = ssub.s32 %s1574_s26, %s2068_s6 }
  0x14   : > { %s173_s13 = sadd.s32 1, %s1550_s20  ;;  %s2072_s7 = smov (%p36_p5, %s2070_s7), 0 }
  0x15   : > { %2038 = sst [smem:[#allocation15_spill]] %s2072_s7  ;;  %p1709_p7 = por %p1698_p6, %p161_p4 }
  0x16   : > { %p183_p8 = scmp.ne.s32.totalorder %s1550_s20, %s1546_s19  ;;  %s142_s15 = ssub.s32 %s1578_s27, %s2072_s7 }
  0x17   : > { %s2039_s14 = scalar_select %p1709_p7, 1, 0 }
  0x18   : > { %p189_p9 = scmp.ne.s32.totalorder %s1546_s19, %s1542_s18  ;;  %p143_p10 = scmp.eq.s32.totalorder %s142_s15, 0 }
  0x19   : > { %2040 = sst [smem:[#allocation16_spill]] %s2039_s14  ;;  %s170_s16 = sor.u32 %s168_s12, %s142_s15 }
  0x1a   : > { %p171_p11 = scmp.eq.s32.totalorder %s170_s16, 0  ;;  %p1721_p12 = por %p183_p8, %p1683_p2 }
  0x1b   : > { %s1726_s29 = scalar_select %p143_p10, %s1562_s23, %s145_s8  }
  0x1c   : > { %s1729_s30 = scalar_select %p171_p11, %s1550_s20, %s173_s13  }
  0x1d   : > { %2042 = sst [smem:[#allocation17_spill]] %s1726_s29  ;;  %p1733_p13 = por %p189_p9, %p1698_p6 }
  0x1e   : > { %2043 = sst [smem:[#allocation18_spill]] %s1729_s30  ;;  %p1080_p0 = scmp.ge.s32.totalorder %s1582_s28, 1 }
  0x1f   : > { %s2044_s6 = scalar_select %p1733_p13, 1, 0 }
  0x20   : > { %p241_p1 = scmp.lt.s32.totalorder %s1582_s28, 5 }
  0x21   : > { %2045 = sst [smem:[#allocation19_spill]] %s2044_s6 }
  0x22   : > { %p242_p4 = pnand %p1080_p0, %p241_p1 }
  0x23   : > { %s2021_s8 = sand.u32 (!%p242_p4), 1, %s1546_s19   ;;  %s1082_s11 = sshll.u32 (!%p242_p4), %s1566_s24, 4 }
  0x24   : > { %245 = sbr.rel (%p242_p4) target bundleno = 420 (0x1a4), region = 36  ;;  %s1081_s12 = sshll.u32 (!%p242_p4), %s2021_s8, 6 }
  0x25   : > { %p287_p2 = scmp.lt.s32.totalorder (!%p242_p4), %s1082_s11, 31  ;;  %s1745_s13 = sshll.u32 (!%p242_p4), %s1570_s25, 4 }
  0x26   : > { %p293_p5 = scmp.lt.s32.totalorder (!%p242_p4), %s1745_s13, 31  ;;  %p304_p6 = scmp.lt.s32.totalorder (!%p242_p4), %s1570_s25, 1 }
  0x27   : > { %s2046_s27 = sand.u32 (!%p242_p4), 1, %s1558_s22   ;;  %p1088_p8 = scmp.ne.s32.totalorder (!%p242_p4), %s1566_s24, 0 }
  0x29   : > { %s2074_s11 = smov (!%p287_p2, %s1082_s11), 31 }
  0x2a   : > { %s294_s15 = scalar_select %p293_p5, %s1745_s13, 31 }
  0x2b   : > { %s1083_s16 = sshll.u32 %s2074_s11, 2  ;;  %s1087_s7 = sshll.u32 %s2074_s11, 3 }
  0x2c   : > { %s1753_s9 = scalar_lea.vmem %s2011_s0, %s1083_s16  ;;  %s1085_s29 = sshll.u32 %s294_s15, 2 }
  0x2d   : > { %s1758_s30 = scalar_lea.vmem %s2012_s1, %s1085_s29  ;;  %s1763_s18 = scalar_lea.vmem %s2013_s2, %s1087_s7 }
  0x2e   : > { %s1766_s14 = scalar_select %p304_p6, %s1570_s25, 1 }
  0x2f   : > { %s1774_s16 = scalar_lea.vmem [#allocation2], %s2046_s27  ;;  %s1776_s15 = scalar_lea.vmem [#allocation4], %s1081_s12 }
  0x30   : > { %s306_s26 = scalar_lea.vmem %s2014_s3, %s1766_s14  ;;  %312 = sbr.rel (%p1088_p8) target bundleno = 55 (0x37), region = 40 }
  0x35   : > { %v1584_v0 = vmov 0.0  }
  0x36   : > { %313 = vst [vmem:[%s1774_s16] sm:$0x1] %v1584_v0 }
  0x37 PF: > { %v1388_v1 = vld [vmem:[%s1758_s30 + $0x38] sm:$0xff]   ;;  %vm426_vm0 = vcmask 261120   ;;  %v1389_v2 = vld [vmem:[%s1758_s30 + $0x30] sm:$0xff]   ;;  %v1585_v4 = vmov 0   ;;  %v1390_v5 = vld [vmem:[%s1758_s30 + $0x28] sm:$0xff]   ;;  %s1153_s21 = sshll.u32 %s1566_s24, 5 }
  0x38   : > { %1265 = vmatprep.subr.msk.bf16.mxu0 %vm426_vm0, %v1388_v1  ;;  %1266 = vmatprep.subr.msk.bf16.mxu1 %vm426_vm0, %v1388_v1  ;;  %v473_v3 = vsel %vm426_vm0, %v1388_v1, 0  ;;  %v470_v6 = vsel %vm426_vm0, %v1389_v2, 0  ;;  %v1396_v7 = vld [vmem:[%s1753_s9] sm:$0xff]   ;;  %v467_v9 = vsel %vm426_vm0, %v1390_v5, 0  ;;  %v574_v12 = vld [vmem:[%s1763_s18 + $0x10] sm:$0xff]  ;;  %v573_v13 = vld [vmem:[%s1763_s18 + $0x8] sm:$0xff]  ;;  %s937_s23 = sadd.s32 %s1570_s25, %s1153_s21 }
  0x39   : > { %1218 = vmatpush3.bf16.xpose.msra.mxu0 %v473_v3  ;;  %1257 = vmatpush3.bf16.xpose.msra.mxu1 %v473_v3  ;;  %v1397_v8 = vld [vmem:[%s1753_s9 + $0x20] sm:$0xff]   ;;  %v575_v14 = vld [vmem:[%s1763_s18 + $0x18] sm:$0xff]  ;;  %v577_v16 = vld [vmem:[%s1763_s18 + $0x28] sm:$0xff]  ;;  %s1134_s6 = sshll.u32 %s937_s23, 6  ;;  %s940_s7 = sshll.u32 %s1776_s15, 4  ;;  %s1917_s7 = int_to_ptr.vmem [resolvable:$true] %s940_s7 }
  0x3a   : > { %1267 = vmatprep.subr.msk.bf16.mxu0 %vm426_vm0, %v1389_v2  ;;  %1268 = vmatprep.subr.msk.bf16.mxu1 %vm426_vm0, %v1389_v2  ;;  %v1391_v10 = vld [vmem:[%s1758_s30 + $0x20] sm:$0xff]   ;;  %v1392_v18 = vld [vmem:[%s1758_s30 + $0x18] sm:$0xff]   ;;  %v578_v19 = vld [vmem:[%s1763_s18 + $0x30] sm:$0xff]  ;;  %s1914_s25 = scalar_lea.hbm %s2016_s5, %s1134_s6  ;;  %s2047_s29 = sand.u32 1, %s1546_s19  }
  0x3b   : > { %1386 = vset.pattern.permute.xlu0 %v1585_v4  ;;  %1387 = vset.pattern.permute.xlu1 %v1585_v4  ;;  %v572_v11 = vld [vmem:[%s1763_s18] sm:$0xff]  ;;  %v464_v17 = vsel %vm426_vm0, %v1391_v10, 0  ;;  %v579_v20 = vld [vmem:[%s1763_s18 + $0x38] sm:$0xff]  ;;  %v581_v22 = vld [vmem:[%s1763_s18 + $0x48] sm:$0xff]  ;;  %v461_v23 = vsel %vm426_vm0, %v1392_v18, 0  ;;  %s1586_s8 = smov [#allocation4]  }
  0x3c   : > { %1233 = vmatprep.mubr.msk.bf16.mxu0 %vm426_vm0, %v1396_v7  ;;  %1241 = vmatprep.mubr.msk.bf16.mxu1 %vm426_vm0, %v1397_v8  ;;  %v576_v15 = vld [vmem:[%s1763_s18 + $0x20] sm:$0xff]  ;;  %v1393_v24 = vld [vmem:[%s1758_s30 + $0x10] sm:$0xff]   ;;  %v583_v26 = vld [vmem:[%s1763_s18 + $0x58] sm:$0xff]  ;;  %s1440_s12 = sshll.u32 %s1586_s8, 4  ;;  %s1441_s12 = int_to_ptr.vmem [resolvable:$false] %s1440_s12 }
  0x3d   : > { %591 = vperm.xlu0 %1386, %v572_v11   ;;  %601 = vperm.xlu1 %1387, %v574_v12   ;;  %v580_v21 = vld [vmem:[%s1763_s18 + $0x40] sm:$0xff]  ;;  %v582_v25 = vld [vmem:[%s1763_s18 + $0x50] sm:$0xff]  ;;  %v585_v28 = vld [vmem:[%s1763_s18 + $0x68] sm:$0xff]  ;;  %v458_v29 = vsel %vm426_vm0, %v1393_v24, 0  ;;  %s1442_s11 = scalar_lea.vmem %s1441_s12, 2048  ;;  %p1443_p0 = scmp.lt.s32.totalorder %s1917_s7, %s1441_s12 }
  0x3e   : > { %v584_v27 = vld [vmem:[%s1763_s18 + $0x60] sm:$0xff]  ;;  %v1394_v30 = vld [vmem:[%s1758_s30 + $0x8] sm:$0xff]   ;;  %v586_v31 = vld [vmem:[%s1763_s18 + $0x70] sm:$0xff] }
  0x3f   : > { %v587_v32 = vld [vmem:[%s1763_s18 + $0x78] sm:$0xff]  ;;  %v455_v33 = vsel %vm426_vm0, %v1394_v30, 0  ;;  %v1395_v34 = vld [vmem:[%s1758_s30] sm:$0xff]   ;;  %v1398_v36 = vld [vmem:[%s1753_s9 + $0x8] sm:$0xff]   ;;  %s1923_s30 = scalar_lea.sflag [#allocation5], %s2047_s29 }
  0x40   : > { %v452_v35 = vsel %vm426_vm0, %v1395_v34, 0  ;;  %v1399_v37 = vld [vmem:[%s1753_s9 + $0x28] sm:$0xff]   ;;  %v1400_v38 = vld [vmem:[%s1753_s9 + $0x10] sm:$0xff]   ;;  %v1402_v40 = vld [vmem:[%s1753_s9 + $0x18] sm:$0xff]  }
  0x41   : > { %1220 = vmatpush3.bf16.xpose.msra.mxu0 %v470_v6  ;;  %1258 = vmatpush3.bf16.xpose.msra.mxu1 %v470_v6  ;;  %v1401_v39 = vld [vmem:[%s1753_s9 + $0x30] sm:$0xff]   ;;  %v1403_v41 = vld [vmem:[%s1753_s9 + $0x38] sm:$0xff]   ;;  %v1849_v54 = vld [vmem:[%s306_s26] ss:$0 sm:$0xff]  ;;  %s1436_s9 = scalar_lea.vmem %s1917_s7, 1024 }
  0x42   : > { %1269 = vmatprep.subr.msk.bf16.mxu0 %vm426_vm0, %v1390_v5  ;;  %1270 = vmatprep.subr.msk.bf16.mxu1 %vm426_vm0, %v1390_v5  ;;  %p1437_p9 = scmp.ne.s32.totalorder %s1917_s7, %s1436_s9  ;;  %p1444_p1 = scmp.lt.s32.totalorder %s1442_s11, %s1436_s9 }
  0x43   : > { %596 = vperm.xlu0 %1386, %v573_v13   ;;  %606 = vperm.xlu1 %1387, %v575_v14  }
  0x44   : > { %p1438_p10 = pnand %p1437_p9, %p1721_p12  ;;  %p1445_p4 = por %p1444_p1, %p1443_p0 }
  0x46   : > { %p1439_p11 = pneg %p1438_p10 }
  0x47   : > { %611 = vperm.xlu0 %1386, %v576_v15   ;;  %616 = vperm.xlu1 %1387, %v577_v16  }
  0x48   : > { %p1446_p2 = pnand %p1445_p4, %p1439_p11 }
  0x49   : > { %1222 = vmatpush3.bf16.xpose.msra.mxu0 %v467_v9  ;;  %1259 = vmatpush3.bf16.xpose.msra.mxu1 %v467_v9 }
  0x4a   : > { %1271 = vmatprep.subr.msk.bf16.mxu0 %vm426_vm0, %v1391_v10  ;;  %1272 = vmatprep.subr.msk.bf16.mxu1 %vm426_vm0, %v1391_v10 }
  0x4b   : > { %621 = vperm.xlu0 %1386, %v578_v19   ;;  %626 = vperm.xlu1 %1387, %v579_v20  }
  0x4f   : > { %631 = vperm.xlu0 %1386, %v580_v21   ;;  %636 = vperm.xlu1 %1387, %v581_v22  }
  0x51   : > { %1224 = vmatpush3.bf16.xpose.msra.mxu0 %v464_v17  ;;  %1260 = vmatpush3.bf16.xpose.msra.mxu1 %v464_v17 }
  0x52   : > { %1273 = vmatprep.subr.msk.bf16.mxu0 %vm426_vm0, %v1392_v18  ;;  %1274 = vmatprep.subr.msk.bf16.mxu1 %vm426_vm0, %v1392_v18 }
  0x53   : > { %641 = vperm.xlu0 %1386, %v582_v25   ;;  %646 = vperm.xlu1 %1387, %v583_v26  }
  0x57   : > { %651 = vperm.xlu0 %1386, %v584_v27   ;;  %656 = vperm.xlu1 %1387, %v585_v28  }
  0x59   : > { %1226 = vmatpush3.bf16.xpose.msra.mxu0 %v461_v23  ;;  %1261 = vmatpush3.bf16.xpose.msra.mxu1 %v461_v23 }
  0x5a   : > { %1275 = vmatprep.subr.msk.bf16.mxu0 %vm426_vm0, %v1393_v24  ;;  %1276 = vmatprep.subr.msk.bf16.mxu1 %vm426_vm0, %v1393_v24 }
  0x5b   : > { %661 = vperm.xlu0 %1386, %v586_v31   ;;  %666 = vperm.xlu1 %1387, %v587_v32  }
  0x61   : > { %1228 = vmatpush3.bf16.xpose.msra.mxu0 %v458_v29  ;;  %1262 = vmatpush3.bf16.xpose.msra.mxu1 %v458_v29 }
  0x62   : > { %1277 = vmatprep.subr.msk.bf16.mxu0 %vm426_vm0, %v1394_v30  ;;  %1278 = vmatprep.subr.msk.bf16.mxu1 %vm426_vm0, %v1394_v30 }
  0x69   : > { %1230 = vmatpush3.bf16.xpose.msra.mxu0 %v455_v33  ;;  %1263 = vmatpush3.bf16.xpose.msra.mxu1 %v455_v33 }
  0x6a   : > { %1279 = vmatprep.subr.msk.bf16.mxu0 %vm426_vm0, %v1395_v34  ;;  %1280 = vmatprep.subr.msk.bf16.mxu1 %vm426_vm0, %v1395_v34 }
  0x71   : > { %1232 = vmatpush3.bf16.xpose.msra.mxu0 %v452_v35  ;;  %1264 = vmatpush3.bf16.xpose.msra.mxu1 %v452_v35 }
  0x78   : > { %1234 = vmatmul.mubr.msk.bf16.vlgmr.msra.gmra.mxu0 %vm426_vm0, %v1398_v36  ;;  %1242 = vmatmul.mubr.msk.bf16.vlgmr.msra.gmra.mxu1 %vm426_vm0, %v1399_v37 }
  0x79   : > { %1237 = vmatprep.mubr.msk.bf16.mxu0 %vm426_vm0, %v1400_v38  ;;  %1245 = vmatprep.mubr.msk.bf16.mxu1 %vm426_vm0, %v1401_v39 }
  0x80   : > { %1238 = vmatmul.mubr.msk.bf16.gmra.mxu0 %vm426_vm0, %v1402_v40  ;;  %1246 = vmatmul.mubr.msk.bf16.gmra.mxu1 %vm426_vm0, %v1403_v41 }
  0xb8   : > { %v592_v42 = vpop.permute.xlu0 %591  ;;  %v602_v43 = vpop.permute.xlu1 %601 }
  0xb9   : > { %v677_v57 = vadd.f32 %v1849_v54, %v602_v43  ;;  %v675_v59 = vadd.f32 %v1849_v54, %v592_v42 }
  0xbe   : > { %v597_v44 = vpop.permute.xlu0 %596  ;;  %v607_v45 = vpop.permute.xlu1 %606 }
  0xbf   : > { %v676_v62 = vadd.f32 %v1849_v54, %v597_v44  ;;  %v678_v2 = vadd.f32 %v1849_v54, %v607_v45 }
  0xc2   : > { %v612_v46 = vpop.permute.xlu0 %611  ;;  %v617_v47 = vpop.permute.xlu1 %616 }
  0xc3   : > { %v1860_v3 = vadd.f32 %v1849_v54, %v612_v46  ;;  %v1863_v4 = vadd.f32 %v1849_v54, %v617_v47 }
  0xc6   : > { %v622_v48 = vpop.permute.xlu0 %621  ;;  %v627_v49 = vpop.permute.xlu1 %626 }
  0xc7   : > { %v1866_v5 = vadd.f32 %v1849_v54, %v622_v48  ;;  %v1869_v14 = vadd.f32 %v1849_v54, %v627_v49 }
  0xca   : > { %v632_v50 = vpop.permute.xlu0 %631  ;;  %v637_v51 = vpop.permute.xlu1 %636 }
  0xcb   : > { %v683_v63 = vadd.f32 %v1849_v54, %v632_v50  ;;  %v684_v15 = vadd.f32 %v1849_v54, %v637_v51 }
  0xce   : > { %v642_v52 = vpop.permute.xlu0 %641  ;;  %v647_v53 = vpop.permute.xlu1 %646 }
  0xcf   : > { %v685_v58 = vadd.f32 %v1849_v54, %v642_v52  ;;  %v686_v16 = vadd.f32 %v1849_v54, %v647_v53 }
  0xd2   : > { %v652_v55 = vpop.permute.xlu0 %651  ;;  %v1851_v56 = vpop.permute.xlu1 %656 }
  0xd3   : > { %v1874_v17 = vadd.f32 %v1849_v54, %v652_v55 }
  0xd6   : > { %v662_v10 = vpop.permute.xlu0 %661  ;;  %v667_v13 = vpop.permute.xlu1 %666 }
  0xd7   : > { %v1877_v24 = vadd.f32 %v1849_v54, %v662_v10  ;;  %v1880_v27 = vadd.f32 %v1849_v54, %v667_v13 }
 0x138   : > { %v1235_v60 = vpop.f32.mrf.mxu0  ;;  %v1243_v61 = vpop.f32.mrf.mxu1 }
 0x139   : > { %v693_v0 = vmul.f32 2.0, %v1235_v60  ;;  %v701_v1 = vmul.f32 2.0, %v1243_v61 }
 0x13a   : > { %v509_v6 = vpop.f32.mrf.mxu0  ;;  %v541_v7 = vpop.f32.mrf.mxu1 }
 0x13b   : > { %v709_v8 = vsub.f32 %v677_v57, %v693_v0  ;;  %v717_v9 = vsub.f32 %v685_v58, %v701_v1  ;;  %v691_v11 = vmul.f32 2.0, %v509_v6  ;;  %v699_v12 = vmul.f32 2.0, %v541_v7 }
 0x13c   : > { %v1236_v18 = vpop.f32.mrf.mxu0  ;;  %v1244_v19 = vpop.f32.mrf.mxu1 }
 0x13d   : > { %v725_v20 = vmax.f32 %v709_v8, 0.0  ;;  %v733_v21 = vmax.f32 %v717_v9, 0.0  ;;  %v707_v22 = vsub.f32 %v675_v59, %v691_v11  ;;  %v715_v23 = vsub.f32 %v683_v63, %v699_v12 }
 0x13e   : > { %v694_v25 = vmul.f32 2.0, %v1236_v18  ;;  %v702_v26 = vmul.f32 2.0, %v1244_v19  ;;  %v512_v28 = vpop.f32.mrf.mxu0  ;;  %v544_v29 = vpop.f32.mrf.mxu1 }
 0x13f   : > { %v741_v30 = vsub.f32 0.0, %v725_v20  ;;  %v749_v31 = vsub.f32 0.0, %v733_v21  ;;  %v723_v32 = vmax.f32 %v707_v22, 0.0  ;;  %v731_v33 = vmax.f32 %v715_v23, 0.0 }
 0x140   : > { %v710_v34 = vsub.f32 %v678_v2, %v694_v25  ;;  %v718_v35 = vsub.f32 %v686_v16, %v702_v26  ;;  %v692_v36 = vmul.f32 2.0, %v512_v28  ;;  %v700_v37 = vmul.f32 2.0, %v544_v29  ;;  %v1239_v38 = vpop.f32.mrf.mxu0  ;;  %v1247_v39 = vpop.f32.mrf.mxu1 }
 0x141   : > { %v757_v40 = vmul.f32 0.03125, %v741_v30  ;;  %v765_v41 = vmul.f32 0.03125, %v749_v31  ;;  %v739_v42 = vsub.f32 0.0, %v723_v32  ;;  %v747_v43 = vsub.f32 0.0, %v731_v33 }
 0x142   : > { %v726_v44 = vmax.f32 %v710_v34, 0.0  ;;  %v734_v45 = vmax.f32 %v718_v35, 0.0  ;;  %v708_v46 = vsub.f32 %v676_v62, %v692_v36  ;;  %v716_v47 = vsub.f32 %v684_v15, %v700_v37  ;;  %v525_v52 = vpop.f32.mrf.mxu0  ;;  %v557_v59 = vpop.f32.mrf.mxu1 }
 0x143   : > { %v775_v48 = vmul.f32 1.442695, %v757_v40  ;;  %v791_v49 = vmul.f32 1.442695, %v765_v41  ;;  %v755_v50 = vmul.f32 0.03125, %v739_v42  ;;  %v763_v51 = vmul.f32 0.03125, %v747_v43 }
 0x144   : > { %v742_v53 = vsub.f32 0.0, %v726_v44  ;;  %v750_v55 = vsub.f32 0.0, %v734_v45  ;;  %v724_v57 = vmax.f32 %v708_v46, 0.0  ;;  %v732_v58 = vmax.f32 %v716_v47, 0.0  ;;  %v1240_v8 = vpop.f32.mrf.mxu0  ;;  %v1248_v12 = vpop.f32.mrf.mxu1 }
 0x145   : > { %1404 = vpow2.f32 %v775_v48  ;;  %v771_v60 = vmul.f32 1.442695, %v755_v50  ;;  %v787_v61 = vmul.f32 1.442695, %v763_v51  ;;  %v697_v63 = vmul.f32 2.0, %v1239_v38 }
 0x146   : > { %1406 = vpow2.f32 %v791_v49  ;;  %v758_v0 = vmul.f32 0.03125, %v742_v53  ;;  %v766_v1 = vmul.f32 0.03125, %v750_v55  ;;  %v740_v2 = vsub.f32 0.0, %v724_v57  ;;  %v528_v25 = vpop.f32.mrf.mxu0  ;;  %v560_v30 = vpop.f32.mrf.mxu1 }
 0x147   : > { %1408 = vpow2.f32 %v771_v60  ;;  %v748_v62 = vsub.f32 0.0, %v732_v58  ;;  %v713_v6 = vsub.f32 %v1866_v5, %v697_v63  ;;  %v705_v7 = vmul.f32 2.0, %v1247_v39 }
 0x148   : > { %1410 = vpow2.f32 %v787_v61  ;;  %v777_v9 = vmul.f32 1.442695, %v758_v0  ;;  %v793_v10 = vmul.f32 1.442695, %v766_v1  ;;  %v756_v11 = vmul.f32 0.03125, %v740_v2 }
 0x149   : > { %v764_v13 = vmul.f32 0.03125, %v748_v62  ;;  %v729_v15 = vmax.f32 %v713_v6, 0.0  ;;  %v721_v16 = vsub.f32 %v1877_v24, %v705_v7  ;;  %v695_v18 = vmul.f32 2.0, %v525_v52 }
 0x14a   : > { %1412 = vpow2.f32 %v777_v9  ;;  %v773_v19 = vmul.f32 1.442695, %v756_v11  ;;  %v703_v20 = vmul.f32 2.0, %v557_v59  ;;  %v698_v21 = vmul.f32 2.0, %v1240_v8 }
 0x14b   : > { %1414 = vpow2.f32 %v793_v10  ;;  %v789_v22 = vmul.f32 1.442695, %v764_v13  ;;  %v745_v23 = vsub.f32 0.0, %v729_v15  ;;  %v737_v5 = vmax.f32 %v721_v16, 0.0 }
 0x14c   : > { %1416 = vpow2.f32 %v773_v19  ;;  %v711_v26 = vsub.f32 %v1860_v3, %v695_v18  ;;  %v719_v28 = vsub.f32 %v1874_v17, %v703_v20  ;;  %v714_v29 = vsub.f32 %v1869_v14, %v698_v21 }
 0x14d   : > { %1418 = vpow2.f32 %v789_v22  ;;  %v761_v24 = vmul.f32 0.03125, %v745_v23  ;;  %v753_v31 = vsub.f32 0.0, %v737_v5  ;;  %v706_v32 = vmul.f32 2.0, %v1248_v12 }
 0x14e   : > { %v727_v33 = vmax.f32 %v711_v26, 0.0  ;;  %v735_v34 = vmax.f32 %v719_v28, 0.0  ;;  %v730_v35 = vmax.f32 %v714_v29, 0.0  ;;  %v696_v36 = vmul.f32 2.0, %v528_v25 }
 0x14f   : > { %v688_v37 = vadd.f32 %v1849_v54, %v1851_v56  ;;  %v769_v38 = vmul.f32 0.03125, %v753_v31  ;;  %v722_v39 = vsub.f32 %v1880_v27, %v706_v32  ;;  %v704_v3 = vmul.f32 2.0, %v560_v30 }
 0x150   : > { %v743_v40 = vsub.f32 0.0, %v727_v33  ;;  %v751_v17 = vsub.f32 0.0, %v735_v34  ;;  %v746_v41 = vsub.f32 0.0, %v730_v35  ;;  %v712_v14 = vsub.f32 %v1863_v4, %v696_v36 }
 0x151   : > { %v783_v42 = vmul.f32 1.442695, %v761_v24  ;;  %v799_v43 = vmul.f32 1.442695, %v769_v38  ;;  %v738_v44 = vmax.f32 %v722_v39, 0.0  ;;  %v720_v45 = vsub.f32 %v688_v37, %v704_v3 }
 0x152   : > { %v1405_v46 = vpop.eup %1404  ;;  %v759_v47 = vmul.f32 0.03125, %v743_v40  ;;  %v767_v48 = vmul.f32 0.03125, %v751_v17  ;;  %v762_v49 = vmul.f32 0.03125, %v746_v41  ;;  %v728_v50 = vmax.f32 %v712_v14, 0.0 }
 0x153   : > { %v1891_v51 = vpop.eup %1406  ;;  %v754_v54 = vsub.f32 0.0, %v738_v44  ;;  %v736_v56 = vmax.f32 %v720_v45, 0.0  ;;  %1420 = vpow2.f32 %v783_v42 }
 0x154   : > { %v1409_v27 = vpop.eup %1408  ;;  %v779_v52 = vmul.f32 1.442695, %v759_v47  ;;  %v785_v53 = vmul.f32 1.442695, %v762_v49  ;;  %v744_v57 = vsub.f32 0.0, %v728_v50  ;;  %1422 = vpow2.f32 %v799_v43 }
 0x155   : > { %v1893_v55 = vpop.eup %1410  ;;  %v770_v4 = vmul.f32 0.03125, %v754_v54  ;;  %v752_v58 = vsub.f32 0.0, %v736_v56  ;;  %v795_v59 = vmul.f32 1.442695, %v767_v48 }
 0x156   : > { %1424 = vpow2.f32 %v779_v52  ;;  %v760_v63 = vmul.f32 0.03125, %v744_v57 }
 0x157   : > { %v1413_v60 = vpop.eup %1412  ;;  %v801_v61 = vmul.f32 1.442695, %v770_v4  ;;  %v768_v0 = vmul.f32 0.03125, %v752_v58  ;;  %1426 = vpow2.f32 %v785_v53 }
 0x158   : > { %v1895_v1 = vpop.eup %1414  ;;  %v1162_v2 = vpack.c.bf16 %v1413_v60, %v1405_v46  ;;  %v781_v7 = vmul.f32 1.442695, %v760_v63 }
 0x159   : > { %v1417_v62 = vpop.eup %1416  ;;  %v1182_v6 = vpack.c.bf16 %v1895_v1, %v1891_v51  ;;  %1428 = vpow2.f32 %v801_v61  ;;  %v797_v8 = vmul.f32 1.442695, %v768_v0 }
 0x15a   : > { %v1899_v9 = vpop.eup %1418  ;;  %1194 = vst [vmem:[%s1776_s15 + $0x8] sm:$0xff] %v1162_v2   ;;  %v804_v10 = vadd.f32 %v1417_v62, %v1409_v27  ;;  %v1157_v11 = vpack.c.bf16 %v1417_v62, %v1409_v27  ;;  %1430 = vpow2.f32 %v795_v59 }
 0x15b   : > { %1198 = vst [vmem:[%s1776_s15 + $0x28] sm:$0xff] %v1182_v6   ;;  %v1177_v12 = vpack.c.bf16 %v1899_v9, %v1893_v55  ;;  %1432 = vpow2.f32 %v781_v7 }
 0x15c   : > { %1158 = vst [vmem:[%s1776_s15] sm:$0xff] %v1157_v11   ;;  %1434 = vpow2.f32 %v797_v8  ;;  %v805_v13 = vadd.f32 %v1405_v46, %v804_v10 }
 0x15d   : > { %1197 = vst [vmem:[%s1776_s15 + $0x20] sm:$0xff] %v1177_v12  }
 0x15e   : > { %v806_v15 = vadd.f32 %v1413_v60, %v805_v13 }
 0x160   : > { %v1421_v16 = vpop.eup %1420 }
 0x161   : > { %v1423_v18 = vpop.eup %1422 }
 0x163   : > { %v1425_v19 = vpop.eup %1424 }
 0x164   : > { %v1427_v20 = vpop.eup %1426  ;;  %v807_v21 = vadd.f32 %v1425_v19, %v806_v15 }
 0x165   : > { %v1172_v23 = vpack.c.bf16 %v1427_v20, %v1421_v16 }
 0x166   : > { %v1429_v22 = vpop.eup %1428 }
 0x167   : > { %v1431_v5 = vpop.eup %1430  ;;  %v1192_v25 = vpack.c.bf16 %v1429_v22, %v1423_v18  ;;  %1196 = vst [vmem:[%s1776_s15 + $0x18] sm:$0xff] %v1172_v23  }
 0x168   : > { %v1433_v26 = vpop.eup %1432 }
 0x169   : > { %v1435_v28 = vpop.eup %1434  ;;  %1200 = vst [vmem:[%s1776_s15 + $0x38] sm:$0xff] %v1192_v25   ;;  %v808_v29 = vadd.f32 %v1433_v26, %v807_v21  ;;  %v1167_v30 = vpack.c.bf16 %v1433_v26, %v1425_v19 }
 0x16a   : > { %v1187_v24 = vpack.c.bf16 %v1435_v28, %v1431_v5 }
 0x16b   : > { %v809_v31 = vadd.f32 %v1421_v16, %v808_v29  ;;  %1195 = vst [vmem:[%s1776_s15 + $0x10] sm:$0xff] %v1167_v30  }
 0x16c   : > { %1199 = vst [vmem:[%s1776_s15 + $0x30] sm:$0xff] %v1187_v24  }
 0x16d   : > { %v810_v32 = vadd.f32 %v1427_v20, %v809_v31 }
 0x16e   : > { %1449 = shalt.err (!%p1446_p2)
}
 0x16f   : > { %s1450_s26 = scalar_lea.hbm %s1914_s25, 1024  ;;  %s1454_s18 = scalar_lea.hbm %s2016_s5, 4096 }
 0x170   : > { %p1451_p5 = scmp.ne.s32.totalorder %s1914_s25, %s1450_s26  ;;  %p1455_p9 = scmp.lt.s32.totalorder %s1914_s25, %s2016_s5 }
 0x171   : > { %p1456_p10 = scmp.lt.s32.totalorder %s1454_s18, %s1450_s26 }
 0x172   : > { %p1452_p6 = pnand %p1451_p5, %p1721_p12 }
 0x173   : > { %p1457_p11 = por %p1456_p10, %p1455_p9 }
 0x174   : > { %p1453_p8 = pneg %p1452_p6 }
 0x176   : > { %p1458_p0 = pnand %p1457_p11, %p1453_p8 }
 0x178   : > { %1461 = shalt.err (!%p1458_p0)
}
 0x179   : > { %s1587_s23 = smov 64   ;;  %s1588_s6 = smov 128   ;;  %v811_v33 = vadd.f32 %v1893_v55, %v810_v32  ;;  %v803_v43 = vld [vmem:[%s1774_s16] sm:$0x1] }
 0x17a   : > { %s1589_s24 = smov 4   ;;  %s925_s17 = sshll.u32 %s1774_s16, 4  ;;  %s926_s17 = int_to_ptr.vmem [resolvable:$true] %s925_s17 }
 0x17b   : > { %1282 = dma.vmem_to_hbm [thread:$0]  (%p1721_p12), %s1917_s7, 1024, %s1914_s25, %s1923_s30, %s1587_s23, %s1588_s6, %s1589_s24   ;;  %v812_v34 = vadd.f32 %v1899_v9, %v811_v33 }
 0x17c   : > { %s923_s25 = scalar_lea.hbm %s2015_s4, %s1745_s13  ;;  %s2048_s29 = sand.u32 1, %s1558_s22  }
 0x17d   : > { %v813_v35 = vadd.f32 %v1891_v51, %v812_v34  ;;  %s908_s30 = scalar_lea.sflag [#allocation3], %s2048_s29  ;;  %s1462_s9 = scalar_lea.vmem %s926_s17, 16 }
 0x17e   : > { %p1463_p12 = scmp.ne.s32.totalorder %s926_s17, %s1462_s9  ;;  %s1590_s8 = smov [#allocation2]  }
 0x17f   : > { %v814_v36 = vadd.f32 %v1895_v1, %v813_v35  ;;  %s1466_s12 = sshll.u32 %s1590_s8, 4  ;;  %s1467_s12 = int_to_ptr.vmem [resolvable:$false] %s1466_s12 }
 0x180   : > { %p1464_p1 = pnand %p1463_p12, %p1692_p3  ;;  %s1468_s11 = scalar_lea.vmem %s1467_s12, 32 }
 0x181   : > { %v815_v37 = vadd.f32 %v1431_v5, %v814_v36  ;;  %p1469_p2 = scmp.lt.s32.totalorder %s926_s17, %s1467_s12  ;;  %p1470_p5 = scmp.lt.s32.totalorder %s1468_s11, %s1462_s9 }
 0x182   : > { %p1465_p4 = pneg %p1464_p1 }
 0x183   : > { %v816_v38 = vadd.f32 %v1435_v28, %v815_v37  ;;  %p1471_p6 = por %p1470_p5, %p1469_p2 }
 0x185   : > { %v817_v39 = vadd.f32 %v1423_v18, %v816_v38  ;;  %p1472_p8 = pnand %p1471_p6, %p1465_p4 }
 0x187   : > { %v818_v3 = vadd.f32 %v1429_v22, %v817_v39 }
 0x189   : > { %v819_v40 = vrot.slane %v818_v3, 4 }
 0x18b   : > { %v820_v17 = vadd.f32 %v819_v40, %v818_v3 }
 0x18d   : > { %v821_v41 = vrot.slane %v820_v17, 2 }
 0x18f   : > { %v822_v14 = vadd.f32 %v821_v41, %v820_v17 }
 0x191   : > { %v823_v42 = vrot.slane %v822_v14, 1 }
 0x193   : > { %v824_v44 = vadd.f32 %v823_v42, %v822_v14 }
 0x195   : > { %v825_v45 = vadd.f32 %v824_v44, %v803_v43 }
 0x197   : > { %826 = vst [vmem:[%s1774_s16] sm:$0x1] %v825_v45 }
 0x198   : > { %1475 = shalt.err (!%p1472_p8)
}
 0x199   : > { %s1476_s26 = scalar_lea.hbm %s923_s25, 16  ;;  %s1480_s27 = scalar_lea.hbm %s2015_s4, 32 }
 0x19a   : > { %p1477_p9 = scmp.ne.s32.totalorder %s923_s25, %s1476_s26  ;;  %p1481_p0 = scmp.lt.s32.totalorder %s923_s25, %s2015_s4 }
 0x19b   : > { %p1482_p12 = scmp.lt.s32.totalorder %s1480_s27, %s1476_s26 }
 0x19c   : > { %p1478_p10 = pnand %p1477_p9, %p1692_p3 }
 0x19d   : > { %p1483_p1 = por %p1482_p12, %p1481_p0 }
 0x19e   : > { %p1479_p11 = pneg %p1478_p10 }
 0x1a0   : > { %p1484_p13 = pnand %p1483_p1, %p1479_p11 }
 0x1a2   : > { %1487 = shalt.err (!%p1484_p13)
}
 0x1a3   : > { %1281 = dma.vmem_to_hbm [thread:$0]  (%p1692_p3), %s926_s17, 16, %s923_s25, %s908_s30  }
 0x1a4 PF: > { %s2049_s20 = sld [smem:[#allocation10_spill]]  ;;  %p1292_p4 = scmp.ge.s32.totalorder %s1582_s28, 2 }
 0x1a6   : > { %p1286_p2 = pnand %p1292_p4, %p1709_p7 }
 0x1a8   : > { %p1287_p5 = pneg %p1286_p2 }
 0x1aa   : > { %s955_s23 = sand.u32 1, %s2049_s20  }
 0x1ab   : > { %s956_s6 = scalar_lea.sflag [#allocation3], %s955_s23 }
 0x1ac   : > { %1533 = dma.done.wait (%p1287_p5), %s956_s6, 16  }
 0x1ad   : > { %1535 = vsyncadd (%p1287_p5), %s956_s6, 4294967280  ;;  %s2051_s24 = sld [smem:[#allocation8_spill]] }
 0x1ae   : > { %s2052_s7 = sld [smem:[#allocation19_spill]] }
 0x1b3   : > { %s963_s14 = sand.u32 1, %s2051_s24  }
 0x1b4   : > { %p2053_p6 = scmp.ne.s32.totalorder %s2052_s7, 0  ;;  %s964_s10 = scalar_lea.sflag [#allocation5], %s963_s14 }
 0x1b6   : > { %p1289_p13 = pnand %p1292_p4, %p2053_p6 }
 0x1b8   : > { %p1290_p8 = pneg %p1289_p13 }
 0x1ba   : > { %1537 = dma.done.wait (%p1290_p8), %s964_s10, 1024  }
 0x1bb   : > { %1539 = vsyncadd (%p1290_p8), %s964_s10, 4294966272  ;;  %s22_s28 = sadd.s32 1, %s1582_s28   ;;  %s2054_s17 = sld [smem:[#allocation9_spill]] }
 0x1bc   : > { %p19_p3 = scmp.ge.s32.totalorder %s22_s28, 6   ;;  %s2055_s20 = sld [smem:[#allocation18_spill]] }
 0x1bd   : > { %s2056_s25 = sld [smem:[#allocation11_spill]]  ;;  %s2062_s18 = smov %s1546_s19 }
 0x1be   : > { %s2057_s23 = sld [smem:[#allocation17_spill]]  ;;  %s2064_s21 = smov %s1558_s22 }
 0x1bf   : > { %s2058_s24 = sld [smem:[#allocation12_spill]] }
 0x1c0   : > { %s2059_s29 = sld [smem:[#allocation13_spill]] }
 0x1c1   : > { %s2060_s26 = sld [smem:[#allocation14_spill]]  ;;  %s2063_s19 = smov %s2054_s17 }
 0x1c2   : > { %s2061_s27 = sld [smem:[#allocation15_spill]]  ;;  %21 = sbr.rel (!%p19_p3) target bundleno = 9 (0x9), region = 101 }
 0x1c3   : > { %s2065_s22 = smov %s2056_s25 }
 0x1c6   : > { %s2066_s25 = smov %s2059_s29 }
 0x1c7   :  { %969 = vsyncpa [#allocation3], 1 }
 0x1c8   :  { %971 = vsyncpa [#allocation3 + $0x1], 1 }
 0x1c9   :  { %972 = vsyncpa [#allocation5], 1 }
 0x1ca   :  { %974 = vsyncpa [#allocation5 + $0x1], 1 }

</bundles_post_ra>
